<compile_context>
chip_gen: v6e
topology: v6e:2x2x1
jax: 0.10.0
libtpu: 0.0.40
codegen_flags: <defaults>
</compile_context>

<pallas_src>
import functools

import jax
import jax.numpy as jnp
from jax.experimental import pallas as pl
from jax.experimental.pallas import tpu as pltpu

LANE = 128
# 4096 x 128 x f32 = 2 MiB per input tile; 2 inputs x 2 pipeline buffers =
# 8 MiB, plus ~12 MiB of live f32 whole-block temporaries inside the body.
# Comfortably under the 48 MiB limit below and v7x's 64 MiB physical VMEM.
MAX_BLOCK_ROWS = 4096
ALIGN_ELEMS = 2 * 8 * LANE        # 2048: keeps rows_half a multiple of 8
_F32_EPS = 1.1920929e-07          # torch.finfo(torch.float32).eps


def _pow(x, exponent):
    """x ** exponent, specialized at trace time for small non-negative integer
    exponents (repeated VPU multiplies instead of exp/log pow on the EUP)."""
    e = float(exponent)
    if e.is_integer() and 0.0 <= e <= 8.0:
        n = int(e)
        if n == 0:
            return jnp.ones_like(x)
        result = None
        base = x
        while n:
            if n & 1:
                result = base if result is None else result * base
            n >>= 1
            if n:
                base = base * base
        return result
    return jnp.power(x, jnp.float32(e))


def _loss_terms(pred, target, *, alpha, gamma, pos_weight, neg_weight):
    """Elementwise gaussian focal loss in f32 (shared by kernel and jnp tail)."""
    p = pred.astype(jnp.float32)
    t = target.astype(jnp.float32)
    one = jnp.float32(1.0)
    eps = jnp.float32(1e-12)
    om_p = one - p
    pos_w = (t == one).astype(jnp.float32)
    neg_w = _pow(one - t, gamma)
    pos_loss = -jnp.log(p + eps) * _pow(om_p, alpha) * pos_w
    neg_loss = -jnp.log(om_p + eps) * _pow(p, alpha) * neg_w
    if float(pos_weight) != 1.0:
        pos_loss = jnp.float32(pos_weight) * pos_loss
    if float(neg_weight) != 1.0:
        neg_loss = jnp.float32(neg_weight) * neg_loss
    return pos_loss + neg_loss


def _gfl_kernel(pred_ref, tgt_ref, out_ref, *, alpha, gamma,
                pos_weight, neg_weight, block_rows):
    """One full (block_rows, LANE) tile of the loss, partial-summed with VPU
    adds into a resident (8, LANE) f32 accumulator block.  No masking: the
    wrapper guarantees every tile is entirely in-bounds."""
    i = pl.program_id(1)                     # reduction axis over row tiles

    @pl.when(i == 0)
    def _init():
        out_ref[...] = jnp.zeros_like(out_ref)

    loss = _loss_terms(pred_ref[0], tgt_ref[0], alpha=alpha, gamma=gamma,
                       pos_weight=pos_weight, neg_weight=neg_weight)
    # (block_rows, LANE) -> (block_rows//8, 8, LANE) is a tile-aligned reshape
    # (no data movement); summing the leading axis is pure vreg adds, so no
    # per-step cross-sublane (XLU) reduce.  The single cross-sublane/lane
    # reduce happens once in the wrapper epilogue.
    out_ref[0] += loss.reshape(block_rows // 8, 8, LANE).sum(axis=0)


def gaussian_focal_loss_pallas(pred, target, *, alpha=2.0, gamma=4.0,
                               pos_weight=1.0, neg_weight=1.0,
                               reduction="mean", loss_weight=1.0,
                               avg_factor=None, max_block_rows=MAX_BLOCK_ROWS):
    """GaussianFocalLoss.forward (pos_inds=None, weight=None path).

    pred/target: same shape (e.g. NCHW gaussian heatmaps), any float dtype.
    Prefer passing bf16 heatmaps: the kernel upcasts to f32 internally, and
    halving input bytes is ~2x wall-clock on HBM-bound parts (especially v5e).
    Returns a scalar for reduction in {'mean', 'sum'} (optionally avg_factor).
    """
    # TODO(synk): pos_inds/pos_labels gather variant, elementwise `weight`
    # tensors and reduction='none' (elementwise output) are not implemented.
    assert pred.shape == target.shape
    assert reduction in ("mean", "sum")
    if avg_factor is not None and reduction != "mean":
        raise ValueError('avg_factor can not be used with reduction="sum"')

    n_total = int(pred.size)
    pred_f = pred.reshape(-1)      # flatten of a contiguous array: bitcast
    tgt_f = target.reshape(-1)

    loss_kw = dict(alpha=alpha, gamma=gamma,
                   pos_weight=pos_weight, neg_weight=neg_weight)

    max_block_rows = max(8, int(max_block_rows))
    n_main = (n_total // ALIGN_ELEMS) * ALIGN_ELEMS
    total = jnp.float32(0.0)

    if n_main:
        rows_half = n_main // (2 * LANE)                  # multiple of 8
        n_tiles = -(-rows_half // max_block_rows)         # ceil
        block_rows = (rows_half // (8 * n_tiles)) * 8     # multiple of 8, <= max
        rows_used = block_rows * n_tiles                  # <= rows_half

        if n_main == n_total:
            pred_main, tgt_main = pred_f, tgt_f
        else:
            # TODO(synk): this prefix slice materializes a copy of the aligned
            # region when n_total is not a multiple of 2048; a fully zero-copy
            # path would need manual 1-D HBM DMAs inside the kernel.
            pred_main, tgt_main = pred_f[:n_main], tgt_f[:n_main]

        pred3 = pred_main.reshape(2, rows_half, LANE)     # bitcast reshape
        tgt3 = tgt_main.reshape(2, rows_half, LANE)

        kernel = functools.partial(_gfl_kernel, block_rows=block_rows,
                                   **loss_kw)
        partials = pl.pallas_call(
            kernel,
            out_shape=jax.ShapeDtypeStruct((2, 8, LANE), jnp.float32),
            grid_spec=pltpu.PrefetchScalarGridSpec(
                num_scalar_prefetch=0,
                grid=(2, n_tiles),
                in_specs=[
                    pl.BlockSpec((1, block_rows, LANE), lambda c, i: (c, i, 0)),
                    pl.BlockSpec((1, block_rows, LANE), lambda c, i: (c, i, 0)),
                ],
                out_specs=pl.BlockSpec((1, 8, LANE), lambda c, i: (c, 0, 0)),
            ),
            compiler_params=pltpu.CompilerParams(
                # Leading size-2 "parallel" axis lets megacore parts (v7x) put
                # one half of the rows on each TensorCore; on single-core
                # chips it is just a serial loop.
                # TODO(synk): if a v7x profile shows only one core active,
                # switch this axis to pltpu.CORE_PARALLEL.
                dimension_semantics=("parallel", "arbitrary"),
                vmem_limit_bytes=48 * 1024 * 1024),
        )(pred3, tgt3)
        # Single cross-sublane/lane reduce of the 2 x 8 x 128 partial sums.
        total = jnp.sum(partials)

        if rows_used != rows_half:
            # Rows at the end of each half not covered by full tiles
            # (< 8 * n_tiles rows per half).  Tiny plain-jnp fused reduce;
            # keeps every kernel tile fully in-bounds (no masking needed).
            lo0, hi0 = rows_used * LANE, rows_half * LANE
            lo1, hi1 = (rows_half + rows_used) * LANE, 2 * rows_half * LANE
            total = total + jnp.sum(
                _loss_terms(pred_f[lo0:hi0], tgt_f[lo0:hi0], **loss_kw))
            total = total + jnp.sum(
                _loss_terms(pred_f[lo1:hi1], tgt_f[lo1:hi1], **loss_kw))

    if n_main != n_total:
        # Unaligned tail (< 2048 elements): plain jnp, no padding copies.
        total = total + jnp.sum(
            _loss_terms(pred_f[n_main:], tgt_f[n_main:], **loss_kw))

    if avg_factor is None:
        if reduction == "mean":
            total = total / jnp.float32(n_total)
    else:
        total = total / (jnp.float32(avg_factor) + jnp.float32(_F32_EPS))
    return jnp.float32(loss_weight) * total


def _reference(pred, target, *, alpha=2.0, gamma=4.0, pos_weight=1.0,
               neg_weight=1.0, loss_weight=1.0, reduction="mean",
               avg_factor=None):
    eps = 1e-12
    p = pred.astype(jnp.float32)
    t = target.astype(jnp.float32)
    pos_w = (t == 1.0).astype(jnp.float32)
    neg_w = (1.0 - t) ** gamma
    pos_loss = -jnp.log(p + eps) * (1.0 - p) ** alpha * pos_w
    neg_loss = -jnp.log(1.0 - p + eps) * p ** alpha * neg_w
    loss = pos_weight * pos_loss + neg_weight * neg_loss
    if avg_factor is None:
        red = jnp.mean(loss) if reduction == "mean" else jnp.sum(loss)
    else:
        red = jnp.sum(loss) / (jnp.float32(avg_factor) + jnp.float32(_F32_EPS))
    return loss_weight * red


if __name__ == "__main__":
    key = jax.random.PRNGKey(0)
    ks = jax.random.split(key, 8)

    def make(shape, kp, kt, pos):
        p = jax.nn.sigmoid(jax.random.normal(kp, shape, jnp.float32))
        t = jax.random.uniform(kt, shape, jnp.float32)
        for idx in pos:
            t = t.at[idx].set(1.0)
        return p, t

    # 1) Lane-aligned NCHW heatmap: one full tile per half, kernel-only path.
    p1, t1 = make((2, 4, 16, 16), ks[0], ks[1],
                  [(0, 0, 3, 5), (1, 2, 10, 11)])
    o1 = jax.block_until_ready(gaussian_focal_loss_pallas(p1, t1))
    r1 = _reference(p1, t1)
    assert jnp.allclose(o1, r1, rtol=1e-5, atol=1e-6), (o1, r1)

    # 2) Tiny unaligned input (< 2048 elements): pure jnp fallback path.
    p2, t2 = make((2, 3, 13, 17), ks[2], ks[3], [(1, 1, 5, 7)])
    o2 = jax.block_until_ready(gaussian_focal_loss_pallas(p2, t2))
    r2 = _reference(p2, t2)
    assert jnp.allclose(o2, r2, rtol=1e-5, atol=1e-6), (o2, r2)

    # 3) Multi-tile grid + leftover-rows path (small max_block_rows override),
    #    reduction='sum' and non-default loss_weight.
    p3, t3 = make((2, 4, 32, 24), ks[4], ks[5],
                  [(0, 1, 2, 3), (1, 3, 30, 20)])
    o3 = jax.block_until_ready(
        gaussian_focal_loss_pallas(p3, t3, reduction="sum", loss_weight=0.5,
                                   max_block_rows=16))
    r3 = _reference(p3, t3, reduction="sum", loss_weight=0.5)
    assert jnp.allclose(o3, r3, rtol=1e-5, atol=1e-5), (o3, r3)

    # 4) Aligned prefix through the kernel + unaligned jnp tail + avg_factor.
    p4, t4 = make((1, 2, 40, 40), ks[6], ks[7], [(0, 0, 7, 9)])
    o4 = jax.block_until_ready(
        gaussian_focal_loss_pallas(p4, t4, avg_factor=37.0))
    r4 = _reference(p4, t4, avg_factor=37.0)
    assert jnp.allclose(o4, r4, rtol=1e-5, atol=1e-6), (o4, r4)

    print("KERNEL_OK")
</pallas_src>

<mosaic_0001>
module attributes {stable_mosaic.version = 11 : i64} {
  func.func @_gfl_kernel(%arg0: i32, %arg1: i32, %arg2: memref<1x8x128xf32, #tpu.memory_space<vmem>>, %arg3: memref<1x8x128xf32, #tpu.memory_space<vmem>>, %arg4: memref<1x8x128xf32, #tpu.memory_space<vmem>>) attributes {dimension_semantics = [#tpu.dimension_semantics<parallel>, #tpu.dimension_semantics<arbitrary>], iteration_bounds = array<i64: 2, 1>, scalar_prefetch = 0 : i64, scratch_operands = 0 : i64, tpu.core_type = #tpu.core_type<tc>, window_params = [{transform_indices = @transform_0, window_bounds = array<i64: 1, 8, 128>}, {transform_indices = @transform_1, window_bounds = array<i64: 1, 8, 128>}, {transform_indices = @transform_2, window_bounds = array<i64: 1, 8, 128>}]} {
    %c0_i32 = arith.constant 0 : i32
    %0 = arith.cmpi eq, %arg1, %c0_i32 : i32
    %1 = arith.extui %0 : i1 to i32
    %c0_i32_0 = arith.constant 0 : i32
    %2 = arith.cmpi ne, %1, %c0_i32_0 : i32
    scf.if %2 {
      %cst_19 = arith.constant 0.000000e+00 : f32
      %42 = vector.broadcast %cst_19 : f32 to vector<1x8x128xf32>
      %c0_20 = arith.constant 0 : index
      %c0_21 = arith.constant 0 : index
      %c0_22 = arith.constant 0 : index
      %43 = vector.load %arg4[%c0_20, %c0_21, %c0_22] : memref<1x8x128xf32, #tpu.memory_space<vmem>>, vector<1x8x128xf32>
      tpu.vector_store %arg4[%c0_20, %c0_21, %c0_22], %42 {strides = array<i32>} : memref<1x8x128xf32, #tpu.memory_space<vmem>>, vector<1x8x128xf32>,
    } else {
    }
    %c0 = arith.constant 0 : index
    %c0_1 = arith.constant 0 : index
    %c0_2 = arith.constant 0 : index
    %3 = vector.load %arg2[%c0, %c0_1, %c0_2] : memref<1x8x128xf32, #tpu.memory_space<vmem>>, vector<1x8x128xf32>
    %4 = vector.shape_cast %3 : vector<1x8x128xf32> to vector<8x128xf32>
    %c0_3 = arith.constant 0 : index
    %c0_4 = arith.constant 0 : index
    %c0_5 = arith.constant 0 : index
    %5 = vector.load %arg3[%c0_3, %c0_4, %c0_5] : memref<1x8x128xf32, #tpu.memory_space<vmem>>, vector<1x8x128xf32>
    %6 = vector.shape_cast %5 : vector<1x8x128xf32> to vector<8x128xf32>
    %cst = arith.constant 1.000000e+00 : f32
    %7 = vector.broadcast %cst : f32 to vector<8x128xf32>
    %8 = arith.subf %7, %4 : vector<8x128xf32>
    %cst_6 = arith.constant 1.000000e+00 : f32
    %9 = vector.broadcast %cst_6 : f32 to vector<8x128xf32>
    %10 = arith.cmpf oeq, %6, %9 : vector<8x128xf32>
    %11 = arith.extui %10 : vector<8x128xi1> to vector<8x128xi32>
    %12 = arith.sitofp %11 : vector<8x128xi32> to vector<8x128xf32>
    %cst_7 = arith.constant 1.000000e+00 : f32
    %13 = vector.broadcast %cst_7 : f32 to vector<8x128xf32>
    %14 = arith.subf %13, %6 : vector<8x128xf32>
    %15 = arith.mulf %14, %14 : vector<8x128xf32>
    %16 = arith.mulf %15, %15 : vector<8x128xf32>
    %cst_8 = arith.constant 9.99999996E-13 : f32
    %17 = vector.broadcast %cst_8 : f32 to vector<8x128xf32>
    %18 = arith.addf %4, %17 : vector<8x128xf32>
    %19 = math.log %18 : vector<8x128xf32>
    %cst_9 = arith.constant 0.000000e+00 : f32
    %20 = vector.broadcast %cst_9 : f32 to vector<8x128xf32>
    %21 = arith.subf %20, %19 : vector<8x128xf32>
    %22 = arith.mulf %8, %8 : vector<8x128xf32>
    %23 = arith.mulf %21, %22 : vector<8x128xf32>
    %24 = arith.mulf %23, %12 : vector<8x128xf32>
    %cst_10 = arith.constant 9.99999996E-13 : f32
    %25 = vector.broadcast %cst_10 : f32 to vector<8x128xf32>
    %26 = arith.addf %8, %25 : vector<8x128xf32>
    %27 = math.log %26 : vector<8x128xf32>
    %cst_11 = arith.constant 0.000000e+00 : f32
    %28 = vector.broadcast %cst_11 : f32 to vector<8x128xf32>
    %29 = arith.subf %28, %27 : vector<8x128xf32>
    %30 = arith.mulf %4, %4 : vector<8x128xf32>
    %31 = arith.mulf %29, %30 : vector<8x128xf32>
    %32 = arith.mulf %31, %16 : vector<8x128xf32>
    %33 = arith.addf %24, %32 : vector<8x128xf32>
    %c0_12 = arith.constant 0 : index
    %c0_13 = arith.constant 0 : index
    %c0_14 = arith.constant 0 : index
    %34 = vector.load %arg4[%c0_12, %c0_13, %c0_14] : memref<1x8x128xf32, #tpu.memory_space<vmem>>, vector<1x8x128xf32>
    %35 = vector.shape_cast %34 : vector<1x8x128xf32> to vector<8x128xf32>
    %36 = vector.shape_cast %33 : vector<8x128xf32> to vector<1x8x128xf32>
    %cst_15 = arith.constant dense<0.000000e+00> : vector<8x128xf32>
    %37 = vector.multi_reduction <add>, %36, %cst_15 [0] : vector<1x8x128xf32> to vector<8x128xf32>
    %38 = arith.addf %35, %37 : vector<8x128xf32>
    %c0_16 = arith.constant 0 : index
    %c0_17 = arith.constant 0 : index
    %c0_18 = arith.constant 0 : index
    %39 = vector.load %arg4[%c0_16, %c0_17, %c0_18] : memref<1x8x128xf32, #tpu.memory_space<vmem>>, vector<1x8x128xf32>
    %40 = vector.shape_cast %39 : vector<1x8x128xf32> to vector<8x128xf32>
    %41 = vector.shape_cast %38 : vector<8x128xf32> to vector<1x8x128xf32>
    tpu.vector_store %arg4[%c0_16, %c0_17, %c0_18], %41 {strides = array<i32>} : memref<1x8x128xf32, #tpu.memory_space<vmem>>, vector<1x8x128xf32>,
    return
  }
  func.func @transform_0(%arg0: i32, %arg1: i32) -> (i32, i32, i32) {
    %c0_i32 = arith.constant 0 : i32
    %c0_i32_0 = arith.constant 0 : i32
    return %arg0, %arg1, %c0_i32 : i32, i32, i32
  }
  func.func @transform_1(%arg0: i32, %arg1: i32) -> (i32, i32, i32) {
    %c0_i32 = arith.constant 0 : i32
    %c0_i32_0 = arith.constant 0 : i32
    return %arg0, %arg1, %c0_i32 : i32, i32, i32
  }
  func.func @transform_2(%arg0: i32, %arg1: i32) -> (i32, i32, i32) {
    %c0_i32 = arith.constant 0 : i32
    %c0_i32_0 = arith.constant 0 : i32
    %c0_i32_1 = arith.constant 0 : i32
    return %arg0, %c0_i32, %c0_i32_0 : i32, i32, i32
  }
}

</mosaic_0001>

<bundles_post_ra>
// kernel: tpu_custom_call.1
= control target key start
LH: loop header
LB: loop body
LE: loop exit
PB: predicated region body
PF: predicated region fallthrough
CT: control target
= control target key end

     0   :  { %7 = vsyncpa [#allocation3], 0  ;;  %s780_s0 = inlined_call_operand.hbm [shape: f32[2,8,128], index: 0, kind: input, shape index: {}]   ;;  %s781_s1 = inlined_call_operand.hbm [shape: f32[2,8,128], index: 1, kind: input, shape index: {}]   ;;  %s782_s2 = inlined_call_operand.hbm [shape: f32[2,8,128], index: 2, kind: output, shape index: {}]  }
   0x1   :  { %9 = vsyncpa [#allocation3 + $0x1], 0 }
   0x2   :  { %10 = vsyncpa [#allocation6], 0 }
   0x3   :  { %12 = vsyncpa [#allocation6 + $0x1], 0 }
   0x4   :  { %13 = vsyncpa [#allocation4], 0 }
   0x5   :  { %15 = vsyncpa [#allocation4 + $0x1], 0  ;;  %s614_s9 = smov 0   ;;  %s616_s10 = smov 0  }
   0x6   :  { %s618_s11 = smov 0   ;;  %s620_s12 = smov 0  }
   0x7   :  { %s622_s13 = smov 0   ;;  %s624_s14 = smov 0  }
   0x8 LB: > { %s364_s15 = sadd.s32 4294967295, %s593_s14   ;;  %s365_s16 = sadd.s32 4294967294, %s593_s14   ;;  %s593_s14 = sphi %s624_s14, %s21_s14   ;;  %s589_s13 = sphi %s622_s13, %s794_s13   ;;  %s585_s12 = sphi %s620_s12, %s793_s12   ;;  %s581_s11 = sphi %s618_s11, %s792_s11   ;;  %s577_s10 = sphi %s616_s10, %s791_s10   ;;  %s573_s9 = sphi %s614_s9, %s790_s9  }
   0x9   : > { %s33_s17 = sadd.s32 1, %s589_s13  ;;  %s42_s18 = sadd.s32 1, %s581_s11 }
   0xa   : > { %p35_p0 = scmp.ge.s32.totalorder %s33_s17, 2  ;;  %p49_p1 = scmp.ne.s32.totalorder %s581_s11, %s577_s10 }
   0xb   : > { %p50_p2 = scmp.eq.s32.totalorder %s593_s14, 0  ;;  %p55_p3 = scmp.ne.s32.totalorder %s577_s10, %s573_s9 }
   0xc   : > { %s796_s17 = smov (%p35_p0, %s33_s17), 0  ;;  %p56_p5 = scmp.eq.s32.totalorder %s364_s15, 0 }
   0xd   : > { %p655_p4 = por %p50_p2, %p49_p1  ;;  %s37_s20 = ssub.s32 %s589_s13, %s796_s17 }
   0xe   : > { %p107_p6 = scmp.eq.s32.totalorder %s364_s15, 1  ;;  %p40_p7 = scmp.eq.s32.totalorder %s37_s20, 0 }
   0xf   : > { %p661_p8 = por %p56_p5, %p55_p3  ;;  %p113_p10 = scmp.eq.s32.totalorder %s365_s16, 1 }
  0x10   : > { %p665_p9 = por %p107_p6, %p49_p1  ;;  %p398_p13 = scmp.lt.s32.totalorder %s593_s14, 2 }
  0x11   : > { %s670_s23 = scalar_select %p40_p7, %s581_s11, %s42_s18  }
  0x12   : > { %p672_p11 = por %p113_p10, %p55_p3  ;;  %s679_s25 = sand.u32 1, %s581_s11  }
  0x13   : > { %s368_s26 = sshll.u32 %s679_s25, 3  ;;  %s369_s27 = sshll.u32 %s589_s13, 7 }
  0x14   : > { %s143_s30 = scalar_lea.hbm %s780_s0, %s369_s27  ;;  %s137_s3 = scalar_lea.vmem [#allocation2], %s368_s26 }
  0x15   : > { %s145_s4 = sshll.u32 %s137_s3, 4  ;;  %p688_p0 = pnand %p398_p13, %p655_p4  ;;  %s146_s4 = int_to_ptr.vmem [resolvable:$true] %s145_s4 }
  0x16   : > { %p372_p1 = scmp.ge.s32.totalorder %s593_s14, 1  ;;  %p169_p2 = scmp.lt.s32.totalorder %s593_s14, 3 }
  0x17   : > { %s134_s6 = scalar_lea.sflag [#allocation3], %s679_s25  ;;  %p455_p3 = pneg %p688_p0 }
  0x18   : > { %s466_s7 = scalar_lea.vmem %s146_s4, 128  ;;  %s595_s8 = smov [#allocation2]  }
  0x19   : > { %p467_p5 = scmp.ne.s32.totalorder %s146_s4, %s466_s7  ;;  %s471_s15 = sshll.u32 %s595_s8, 4  ;;  %s472_s15 = int_to_ptr.vmem [resolvable:$false] %s471_s15 }
  0x1a   : > { %s473_s16 = scalar_lea.vmem %s472_s15, 256  ;;  %p474_p4 = scmp.lt.s32.totalorder %s146_s4, %s472_s15 }
  0x1b   : > { %p469_p6 = pnand %p467_p5, %p455_p3  ;;  %p475_p10 = scmp.lt.s32.totalorder %s473_s16, %s466_s7 }
  0x1d   : > { %p470_p7 = pneg %p469_p6  ;;  %p476_p13 = por %p475_p10, %p474_p4 }
  0x1f   : > { %p477_p12 = pnand %p476_p13, %p470_p7 }
  0x21   : > { %480 = shalt.err (!%p477_p12)
}
  0x22   : > { %390 = dma.hbm_to_vmem [thread:$0]  (!%p688_p0), %s143_s30, 128, %s146_s4, %s134_s6  }
  0x23   : > { %p706_p5 = pnand %p372_p1, %p169_p2  ;;  %s162_s28 = scalar_lea.hbm %s781_s1, %s369_s27 }
  0x24   : > { %s156_s29 = scalar_lea.vmem [#allocation5], %s368_s26  ;;  %s153_s7 = scalar_lea.sflag [#allocation6], %s679_s25 }
  0x25   : > { %s164_s3 = sshll.u32 %s156_s29, 4  ;;  %s596_s30 = smov [#allocation5]   ;;  %s165_s3 = int_to_ptr.vmem [resolvable:$true] %s164_s3 }
  0x26   : > { %s494_s8 = scalar_lea.vmem %s165_s3, 128  ;;  %s499_s4 = sshll.u32 %s596_s30, 4  ;;  %s500_s4 = int_to_ptr.vmem [resolvable:$false] %s499_s4 }
  0x27   : > { %p495_p12 = scmp.ne.s32.totalorder %s165_s3, %s494_s8  ;;  %s501_s6 = scalar_lea.vmem %s500_s4, 256 }
  0x28   : > { %p502_p1 = scmp.lt.s32.totalorder %s165_s3, %s500_s4  ;;  %p503_p2 = scmp.lt.s32.totalorder %s501_s6, %s494_s8 }
  0x29   : > { %p497_p6 = pnand %p495_p12, %p455_p3 }
  0x2a   : > { %p504_p4 = por %p503_p2, %p502_p1 }
  0x2b   : > { %p498_p7 = pneg %p497_p6 }
  0x2d   : > { %p505_p10 = pnand %p504_p4, %p498_p7 }
  0x2f   : > { %508 = shalt.err (!%p505_p10)
}
  0x30   : > { %393 = dma.hbm_to_vmem [thread:$0]  (!%p688_p0), %s162_s28, 128, %s165_s3, %s153_s7  }
  0x31   : > { %173 = sbr.rel (%p706_p5) target bundleno = 99 (0x63), region = 28  ;;  %s722_s25 = sand.u32 (!%p706_p5), 1, %s577_s10  }
  0x32   : > { %s725_s26 = sshll.u32 (!%p706_p5), %s722_s25, 3  ;;  %s176_s27 = scalar_lea.sflag (!%p706_p5), [#allocation3], %s722_s25 }
  0x33   : > { %s179_s15 = scalar_lea.vmem (!%p706_p5), [#allocation2], %s725_s26 }
  0x36   : > { %560 = dma.done.wait (%p661_p8), %s176_s27, 128  }
  0x37   : > { %562 = vsyncadd (%p661_p8), %s176_s27, 4294967168  ;;  %s185_s5 = scalar_lea.sflag [#allocation6], %s722_s25  ;;  %s188_s16 = scalar_lea.vmem [#allocation5], %s725_s26 }
  0x38   : > { %564 = dma.done.wait (%p661_p8), %s185_s5, 128  }
  0x39   : > { %566 = vsyncadd (%p661_p8), %s185_s5, 4294967168  ;;  %v219_v0 = vld [vmem:[%s179_s15] sm:$0xff]  ;;  %v220_v4 = vld [vmem:[%s188_s16] sm:$0xff]  ;;  %v597_v14 = vmov 0.0   ;;  %s378_s21 = sshll.u32 %s585_s12, 7  ;;  %s213_s18 = scalar_lea.vmem [#allocation7], %s725_s26 }
  0x3a   : > { %v221_v1 = vsub.f32 1.0, %v219_v0  ;;  %v228_v2 = vadd.f32 1e-12, %v219_v0  ;;  %v225_v5 = vsub.f32 1.0, %v220_v4  ;;  %vm222_vm0 = vcmp.eq.f32.partialorder %v220_v4, 1.0  ;;  %s261_s19 = sshll.u32 %s213_s18, 4  ;;  %s259_s29 = scalar_lea.hbm %s782_s2, %s378_s21  ;;  %s262_s19 = int_to_ptr.vmem [resolvable:$true] %s261_s19 }
  0x3b   : > { %v239_v13 = vmul.f32 %v219_v0, %v219_v0  ;;  %v376_v15 = vsel %vm222_vm0, 1.0, %v597_v14  ;;  %s248_s3 = scalar_lea.sflag [#allocation4], %s722_s25  ;;  %s509_s7 = scalar_lea.vmem %s262_s19, 128 }
  0x3c   : > { %449 = vlog2.f32 %v228_v2  ;;  %v235_v3 = vadd.f32 1e-12, %v221_v1  ;;  %v226_v7 = vmul.f32 %v225_v5, %v225_v5  ;;  %v232_v9 = vmul.f32 %v221_v1, %v221_v1  ;;  %p510_p8 = scmp.ne.s32.totalorder %s262_s19, %s509_s7  ;;  %s598_s8 = smov [#allocation7]  }
  0x3d   : > { %s513_s30 = sshll.u32 %s598_s8, 4  ;;  %s514_s30 = int_to_ptr.vmem [resolvable:$false] %s513_s30 }
  0x3e   : > { %451 = vlog2.f32 %v235_v3  ;;  %v227_v16 = vmul.f32 %v226_v7, %v226_v7  ;;  %p511_p0 = pnand %p510_p8, %p665_p9  ;;  %s515_s4 = scalar_lea.vmem %s514_s30, 256 }
  0x3f   : > { %p516_p13 = scmp.lt.s32.totalorder %s262_s19, %s514_s30  ;;  %p517_p5 = scmp.lt.s32.totalorder %s515_s4, %s509_s7 }
  0x40   : > { %p512_p3 = pneg %p511_p0 }
  0x41   : > { %p518_p12 = por %p517_p5, %p516_p13 }
  0x43   : > { %p519_p6 = pnand %p518_p12, %p512_p3 }
  0x49   : > { %v450_v6 = vpop.eup %449 }
  0x4a   : > { %v230_v8 = vmul.f32 0.6931472, %v450_v6 }
  0x4b   : > { %v452_v10 = vpop.eup %451 }
  0x4c   : > { %v231_v11 = vsub.f32 0.0, %v230_v8  ;;  %v237_v12 = vmul.f32 0.6931472, %v452_v10 }
  0x4e   : > { %v233_v17 = vmul.f32 %v232_v9, %v231_v11  ;;  %v238_v18 = vsub.f32 0.0, %v237_v12 }
  0x50   : > { %v234_v19 = vmul.f32 %v376_v15, %v233_v17  ;;  %v240_v20 = vmul.f32 %v239_v13, %v238_v18 }
  0x52   : > { %v241_v21 = vmul.f32 %v240_v20, %v227_v16 }
  0x54   : > { %v242_v22 = vadd.f32 %v241_v21, %v234_v19 }
  0x56   : > { %246 = vst [vmem:[%s213_s18] sm:$0xff] %v242_v22 }
  0x57   : > { %522 = shalt.err (!%p519_p6)
}
  0x58   : > { %s523_s12 = scalar_lea.hbm %s259_s29, 128  ;;  %s527_s26 = scalar_lea.hbm %s782_s2, 256 }
  0x59   : > { %p524_p7 = scmp.ne.s32.totalorder %s259_s29, %s523_s12  ;;  %p528_p4 = scmp.lt.s32.totalorder %s259_s29, %s782_s2 }
  0x5a   : > { %p529_p10 = scmp.lt.s32.totalorder %s527_s26, %s523_s12 }
  0x5b   : > { %p525_p1 = pnand %p524_p7, %p665_p9 }
  0x5c   : > { %p530_p8 = por %p529_p10, %p528_p4 }
  0x5d   : > { %p526_p2 = pneg %p525_p1 }
  0x5f   : > { %p531_p0 = pnand %p530_p8, %p526_p2 }
  0x61   : > { %534 = shalt.err (!%p531_p0)
}
  0x62   : > { %385 = dma.vmem_to_hbm [thread:$0]  (%p665_p9), %s262_s19, 128, %s259_s29, %s248_s3  }
  0x63 PF: > { %s273_s5 = sand.u32 1, %s573_s9   ;;  %p789_p3 = scmp.ge.s32.totalorder %s593_s14, 2 }
  0x64   : > { %s274_s16 = scalar_lea.sflag [#allocation4], %s273_s5 }
  0x65   : > { %p395_p13 = pnand %p789_p3, %p672_p11 }
  0x67   : > { %p396_p5 = pneg %p395_p13 }
  0x69   : > { %568 = dma.done.wait (%p396_p5), %s274_s16, 128  }
  0x6a   : > { %570 = vsyncadd (%p396_p5), %s274_s16, 4294967168  ;;  %s21_s14 = sadd.s32 1, %s593_s14   ;;  %s790_s9 = smov %s577_s10 }
  0x6b   : > { %p18_p12 = scmp.ge.s32.totalorder %s21_s14, 4   ;;  %s791_s10 = smov %s581_s11 }
  0x6c   : > { %s792_s11 = smov %s670_s23  ;;  %s793_s12 = smov %s589_s13 }
  0x6d   : > { %s794_s13 = smov %s796_s17  ;;  %20 = sbr.rel (!%p18_p12) target bundleno = 8 (0x8), region = 90 }
  0x72   :  { %279 = vsyncpa [#allocation3], 1 }
  0x73   :  { %281 = vsyncpa [#allocation3 + $0x1], 1 }
  0x74   :  { %282 = vsyncpa [#allocation6], 1 }
  0x75   :  { %284 = vsyncpa [#allocation6 + $0x1], 1 }
  0x76   :  { %285 = vsyncpa [#allocation4], 1 }
  0x77   :  { %287 = vsyncpa [#allocation4 + $0x1], 1 }

</bundles_post_ra>
